<compile_context>
chip_gen: v7x
topology: tpu7x:2x2x1
jax: 0.10.0
libtpu: 0.0.40
codegen_flags: <defaults>
</compile_context>

<pallas_src>
import functools

import jax
import jax.numpy as jnp
from jax.experimental import pallas as pl
from jax.experimental.pallas import tpu as pltpu


_TARGET_BLOCK_BYTES = 4 * 1024 * 1024   # copies reach ~85% of HBM roofline from ~1 MiB tiles
_MIN_BLOCK_BYTES = 1 * 1024 * 1024      # never shrink blocks below this for step-count reasons
_MIN_GRID_STEPS = 4                     # >= 2 steps per TensorCore on dual-core (v7x) chips
_VMEM_HEADROOM = 4 * 1024 * 1024        # Mosaic internal scratch / misc slack


def _crop_kernel(x_ref, o_ref, *, top, left, h_out, w_out):
    # x_ref: (nc_blk, H, W) input planes; o_ref: (nc_blk, H_out, W_out).
    # Static offsets -> a single strided VMEM->VMEM copy; when left == 0 and
    # w_out == w the lane dim is untouched (no lane relayout, unmasked stores).
    o_ref[...] = x_ref[:, top:top + h_out, left:left + w_out]


def _sublane_tile(dtype) -> int:
    # Sublane packing: 8 rows for 4-byte, 16 for 2-byte, 32 for 1-byte dtypes.
    return max(8, 32 // jnp.dtype(dtype).itemsize)


def _padded_plane_bytes(h, w, dtype) -> int:
    # Real VMEM footprint of one (h, w) plane after (sublane, 128-lane) tiling.
    sub = _sublane_tile(dtype)
    h_pad = pl.cdiv(h, sub) * sub
    w_pad = pl.cdiv(w, 128) * 128
    return h_pad * w_pad * jnp.dtype(dtype).itemsize


def _vmem_capacity_bytes() -> int:
    try:
        return int(pltpu.get_tpu_info().vmem_capacity_bytes)
    except Exception:
        return 64 * 1024 * 1024   # conservative fallback: v7x per-TensorCore VMEM


def _pick_nc_block(nc, pair_bytes, vmem_usable) -> int:
    """Planes per grid step, from padded bytes (not nc's factorization)."""
    by_vmem = max(1, vmem_usable // (2 * pair_bytes))        # double-buffered
    by_bw = max(1, _TARGET_BLOCK_BYTES // pair_bytes)        # bandwidth target
    nc_blk = max(1, min(nc, by_vmem, by_bw))
    # Prefer >= _MIN_GRID_STEPS steps (pipeline ramp; 2 per core on v7x), but
    # only if the shrunken block still carries >= ~1 MiB of padded traffic.
    steps_target_blk = pl.cdiv(nc, _MIN_GRID_STEPS)
    if steps_target_blk < nc_blk and steps_target_blk * pair_bytes >= _MIN_BLOCK_BYTES:
        nc_blk = steps_target_blk
    return nc_blk


def crop2d(x, crop, *, nc_block=None):
    """Crop a BCHW tensor; crop = (left, right, top, bottom) (PyTorch Crop2d)."""
    assert len(crop) == 4
    left, right, top, bottom = (int(v) for v in crop)
    assert min(left, right, top, bottom) >= 0, "negative crop not supported"
    n, c, h, w = x.shape
    assert top + bottom < h and left + right < w, "crop removes entire extent"
    h_out = h - top - bottom
    w_out = w - left - right

    if left == right == top == bottom == 0:
        return x  # no-op crop

    # Flatten (N, C): the crop is identical per plane and the reshape of a
    # contiguous NCHW buffer is free; one grid step streams many planes.
    nc = n * c
    x3 = x.reshape(nc, h, w)

    itemsize = jnp.dtype(x.dtype).itemsize
    # Padded (tiled) VMEM footprint of one input+output plane pair.
    pair_bytes = (_padded_plane_bytes(h, w, x.dtype)
                  + _padded_plane_bytes(h_out, w_out, x.dtype))

    vmem_cap = _vmem_capacity_bytes()
    vmem_usable = max((vmem_cap * 3) // 4 - _VMEM_HEADROOM, 8 * 1024 * 1024)

    if nc_block is not None:
        nc_blk = max(1, min(int(nc_block), nc))
    else:
        nc_blk = _pick_nc_block(nc, pair_bytes, vmem_usable)
    grid_steps = pl.cdiv(nc, nc_blk)

    vmem_needed = 2 * nc_blk * pair_bytes + _VMEM_HEADROOM
    vmem_limit = int(min((vmem_cap * 3) // 4, max(vmem_needed, 16 * 1024 * 1024)))
    # TODO(synk): if a *single* plane pair exceeds the cap (huge planes on
    # v7x's 64 MiB VMEM) an H-tiling grid axis with element-offset input
    # windows is required; not implemented here.

    kernel = functools.partial(
        _crop_kernel, top=top, left=left, h_out=h_out, w_out=w_out)

    cost = pl.CostEstimate(
        flops=0,
        transcendentals=0,
        bytes_accessed=(nc * h * w + nc * h_out * w_out) * itemsize,
    )

    out3 = pl.pallas_call(
        kernel,
        out_shape=jax.ShapeDtypeStruct((nc, h_out, w_out), x.dtype),
        grid=(grid_steps,),
        in_specs=[
            # Trailing block dims equal the full array H/W -> the (8,128)
            # divisibility rule holds for any shape/crop/dtype. Only the plane
            # axis is blocked; the ragged last block (nc % nc_blk != 0) is
            # edge-clipped by Blocked mode, harmless for a pure copy.
            pl.BlockSpec((nc_blk, h, w), lambda i: (i, 0, 0)),
        ],
        out_specs=pl.BlockSpec((nc_blk, h_out, w_out), lambda i: (i, 0, 0)),
        compiler_params=pltpu.CompilerParams(
            dimension_semantics=("parallel",),
            vmem_limit_bytes=vmem_limit,
        ),
        cost_estimate=cost,
    )(x3)

    return out3.reshape(n, c, h_out, w_out)


if __name__ == "__main__":
    key = jax.random.PRNGKey(0)
    # Small BCHW input consistent with the module's assumptions.
    x = jax.random.normal(key, (2, 4, 16, 16), dtype=jnp.float32)
    crop = (1, 2, 3, 1)  # (left, right, top, bottom)
    left, right, top, bottom = crop
    ref = x[:, :, top:x.shape[-2] - bottom, left:x.shape[-1] - right]

    # 1) Default path (auto block choice; single grid step at this size).
    out = jax.block_until_ready(crop2d(x, crop))
    assert out.shape == ref.shape, (out.shape, ref.shape)
    assert out.dtype == ref.dtype, (out.dtype, ref.dtype)
    assert jnp.array_equal(out, ref), "mismatch vs reference slice (default path)"

    # 2) Forced non-dividing block (nc=8, nc_blk=3): exercises the cdiv grid
    #    and the ragged (edge-clipped) last block.
    out_ragged = jax.block_until_ready(crop2d(x, crop, nc_block=3))
    assert jnp.array_equal(out_ragged, ref), "mismatch vs reference slice (ragged path)"

    print("KERNEL_OK")
</pallas_src>

<mosaic_0001>
module attributes {stable_mosaic.version = 11 : i64} {
  func.func @_crop_kernel(%arg0: i32, %arg1: memref<8x16x16xf32, #tpu.memory_space<vmem>>, %arg2: memref<8x12x13xf32, #tpu.memory_space<vmem>>) attributes {dimension_semantics = [#tpu.dimension_semantics<parallel>], iteration_bounds = array<i64: 1>, scalar_prefetch = 0 : i64, scratch_operands = 0 : i64, tpu.core_type = #tpu.core_type<tc>, window_params = [{transform_indices = @transform_0, window_bounds = array<i64: 8, 16, 16>}, {transform_indices = @transform_1, window_bounds = array<i64: 8, 12, 13>}]} {
    %c0 = arith.constant 0 : index
    %c3 = arith.constant 3 : index
    %c1 = arith.constant 1 : index
    %0 = vector.load %arg1[%c0, %c3, %c1] : memref<8x16x16xf32, #tpu.memory_space<vmem>>, vector<8x12x13xf32>
    %c0_0 = arith.constant 0 : index
    %c0_1 = arith.constant 0 : index
    %c0_2 = arith.constant 0 : index
    %1 = vector.load %arg2[%c0_0, %c0_1, %c0_2] : memref<8x12x13xf32, #tpu.memory_space<vmem>>, vector<8x12x13xf32>
    tpu.vector_store %arg2[%c0_0, %c0_1, %c0_2], %0 {strides = array<i32>} : memref<8x12x13xf32, #tpu.memory_space<vmem>>, vector<8x12x13xf32>,
    return
  }
  func.func @transform_0(%arg0: i32) -> (i32, i32, i32) {
    %c0_i32 = arith.constant 0 : i32
    %c0_i32_0 = arith.constant 0 : i32
    %c0_i32_1 = arith.constant 0 : i32
    return %arg0, %c0_i32, %c0_i32_0 : i32, i32, i32
  }
  func.func @transform_1(%arg0: i32) -> (i32, i32, i32) {
    %c0_i32 = arith.constant 0 : i32
    %c0_i32_0 = arith.constant 0 : i32
    %c0_i32_1 = arith.constant 0 : i32
    return %arg0, %c0_i32, %c0_i32_0 : i32, i32, i32
  }
}

</mosaic_0001>

<bundles_post_ra>
// kernel: tpu_custom_call.1
= control target key start
LH: loop header
LB: loop body
LE: loop exit
PB: predicated region body
PF: predicated region fallthrough
CT: control target
= control target key end

     0   :  { %6 = vsyncpa [#allocation3], 0  ;;  %s153_s6 = smov [#allocation2]   ;;  %s243_s0 = inlined_call_operand.hbm [shape: f32[8,16,16], index: 0, kind: input, shape index: {}]   ;;  %s244_s1 = inlined_call_operand.vmem [shape: f32[8,12,13], index: 1, kind: output, shape index: {}]  }
   0x1   :  { %s12_s7 = sshll.u32 %s153_s6, 4  ;;  %s129_s10 = scalar_lea.hbm %s243_s0, 2048  ;;  %s13_s7 = int_to_ptr.vmem [resolvable:$true] %s12_s7 }
   0x2   :  { %p130_p0 = scmp.ne.s32.totalorder %s243_s0, %s129_s10  ;;  %p133_p1 = scmp.lt.u32.totalorder %s129_s10, %s243_s0 }
   0x4   :  { %p135_p2 = pnand %p133_p1, %p130_p0 }
   0x6   :  { %138 = shalt.err (!%p135_p2)
}
   0x7   :  { %s139_s15 = scalar_lea.vmem %s13_s7, 2048  ;;  %p144_p4 = scmp.lt.s32.totalorder %s13_s7, %s13_s7 }
   0x8   :  { %p140_p3 = scmp.ne.s32.totalorder %s13_s7, %s139_s15  ;;  %p145_p5 = scmp.lt.s32.totalorder %s139_s15, %s139_s15 }
   0xa   :  { %p146_p6 = por %p145_p5, %p144_p4 }
   0xc   :  { %p147_p7 = pnand %p146_p6, %p140_p3 }
   0xe   :  { %150 = shalt.err (!%p147_p7)
}
   0xf   :  { %s154_s16 = smov 128   ;;  %s155_s17 = smov 8  }
  0x10   :  { %18 = dma.hbm_to_vmem [thread:$0]  %s243_s0, 2048, %s13_s7, [#allocation3], %s154_s16, %s154_s16, %s155_s17  }
  0x11   :  { %151 = dma.done.wait [#allocation3], 2048  }
  0x12   :  { %152 = vsyncadd [#allocation3], 4294965248  ;;  %v24_v0 = vld [vmem:[#allocation2 + $0x13] sm:$0xff]  ;;  %v22_v1 = vld [vmem:[#allocation2 + $0x3] sm:$0xff]  ;;  %s156_s20 = smov 127   ;;  %vm102_vm0 = vcmask 105472  }
  0x13   :  { %58 = vrot.lane.b32.xlu1 %v24_v0, %s156_s20  ;;  %54 = vrot.lane.b32.xlu0 %v22_v1, %s156_s20  ;;  %v25_v2 = vld [vmem:[#allocation2 + $0x1b] sm:$0xf]  ;;  %v23_v3 = vld [vmem:[#allocation2 + $0xb] sm:$0xf]  ;;  %v26_v5 = vld [vmem:[#allocation2 + $0x23] sm:$0xff]  ;;  %vm104_vm1 = vcmask 101376  }
  0x14   :  { %v27_v4 = vld [vmem:[#allocation2 + $0x2b] sm:$0xf]  ;;  %v29_v6 = vld [vmem:[#allocation2 + $0x3b] sm:$0xf]  ;;  %v28_v7 = vld [vmem:[#allocation2 + $0x33] sm:$0xff] }
  0x15   :  { %v31_v8 = vld [vmem:[#allocation2 + $0x4b] sm:$0xf]  ;;  %v30_v9 = vld [vmem:[#allocation2 + $0x43] sm:$0xff]  ;;  %v33_v10 = vld [vmem:[#allocation2 + $0x5b] sm:$0xf] }
  0x16   :  { %v32_v11 = vld [vmem:[#allocation2 + $0x53] sm:$0xff]  ;;  %v35_v12 = vld [vmem:[#allocation2 + $0x6b] sm:$0xf]  ;;  %v34_v13 = vld [vmem:[#allocation2 + $0x63] sm:$0xff] }
  0x17   :  { %60 = vrot.lane.b32.xlu1 %v25_v2, %s156_s20  ;;  %56 = vrot.lane.b32.xlu0 %v23_v3, %s156_s20  ;;  %v37_v14 = vld [vmem:[#allocation2 + $0x7b] sm:$0xf]  ;;  %v36_v15 = vld [vmem:[#allocation2 + $0x73] sm:$0xff] }
  0x1b   :  { %64 = vrot.lane.b32.xlu1 %v27_v4, %s156_s20  ;;  %62 = vrot.lane.b32.xlu0 %v26_v5, %s156_s20 }
  0x1f   :  { %68 = vrot.lane.b32.xlu1 %v29_v6, %s156_s20  ;;  %66 = vrot.lane.b32.xlu0 %v28_v7, %s156_s20 }
  0x23   :  { %72 = vrot.lane.b32.xlu1 %v31_v8, %s156_s20  ;;  %70 = vrot.lane.b32.xlu0 %v30_v9, %s156_s20 }
  0x27   :  { %76 = vrot.lane.b32.xlu1 %v33_v10, %s156_s20  ;;  %74 = vrot.lane.b32.xlu0 %v32_v11, %s156_s20 }
  0x2b   :  { %80 = vrot.lane.b32.xlu1 %v35_v12, %s156_s20  ;;  %78 = vrot.lane.b32.xlu0 %v34_v13, %s156_s20 }
  0x2f   :  { %84 = vrot.lane.b32.xlu1 %v37_v14, %s156_s20  ;;  %82 = vrot.lane.b32.xlu0 %v36_v15, %s156_s20 }
  0x85   :  { %v59_v16 = vpop.permute.xlu1 %58  ;;  %v55_v17 = vpop.permute.xlu0 %54 }
  0x86   :  { %106 = vst.msk [vmem:[%s244_s1 + $0x10] sm:$0xff] %vm102_vm0, %v59_v16  ;;  %103 = vst.msk [vmem:[%s244_s1] sm:$0xff] %vm102_vm0, %v55_v17 }
  0x89   :  { %v61_v18 = vpop.permute.xlu1 %60  ;;  %v57_v19 = vpop.permute.xlu0 %56 }
  0x8a   :  { %107 = vst.msk [vmem:[%s244_s1 + $0x18] sm:$0xf] %vm104_vm1, %v61_v18  ;;  %105 = vst.msk [vmem:[%s244_s1 + $0x8] sm:$0xf] %vm104_vm1, %v57_v19 }
  0x8d   :  { %v65_v20 = vpop.permute.xlu1 %64  ;;  %v63_v21 = vpop.permute.xlu0 %62 }
  0x8e   :  { %109 = vst.msk [vmem:[%s244_s1 + $0x28] sm:$0xf] %vm104_vm1, %v65_v20 }
  0x8f   :  { %108 = vst.msk [vmem:[%s244_s1 + $0x20] sm:$0xff] %vm102_vm0, %v63_v21 }
  0x91   :  { %v69_v22 = vpop.permute.xlu1 %68  ;;  %v67_v23 = vpop.permute.xlu0 %66 }
  0x92   :  { %111 = vst.msk [vmem:[%s244_s1 + $0x38] sm:$0xf] %vm104_vm1, %v69_v22 }
  0x93   :  { %110 = vst.msk [vmem:[%s244_s1 + $0x30] sm:$0xff] %vm102_vm0, %v67_v23 }
  0x95   :  { %v73_v24 = vpop.permute.xlu1 %72  ;;  %v71_v25 = vpop.permute.xlu0 %70 }
  0x96   :  { %113 = vst.msk [vmem:[%s244_s1 + $0x48] sm:$0xf] %vm104_vm1, %v73_v24 }
  0x97   :  { %112 = vst.msk [vmem:[%s244_s1 + $0x40] sm:$0xff] %vm102_vm0, %v71_v25 }
  0x99   :  { %v77_v26 = vpop.permute.xlu1 %76  ;;  %v75_v27 = vpop.permute.xlu0 %74 }
  0x9a   :  { %115 = vst.msk [vmem:[%s244_s1 + $0x58] sm:$0xf] %vm104_vm1, %v77_v26 }
  0x9b   :  { %114 = vst.msk [vmem:[%s244_s1 + $0x50] sm:$0xff] %vm102_vm0, %v75_v27 }
  0x9d   :  { %v81_v28 = vpop.permute.xlu1 %80  ;;  %v79_v29 = vpop.permute.xlu0 %78 }
  0x9e   :  { %117 = vst.msk [vmem:[%s244_s1 + $0x68] sm:$0xf] %vm104_vm1, %v81_v28 }
  0x9f   :  { %116 = vst.msk [vmem:[%s244_s1 + $0x60] sm:$0xff] %vm102_vm0, %v79_v29 }
  0xa1   :  { %v85_v30 = vpop.permute.xlu1 %84  ;;  %v83_v31 = vpop.permute.xlu0 %82 }
  0xa2   :  { %119 = vst.msk [vmem:[%s244_s1 + $0x78] sm:$0xf] %vm104_vm1, %v85_v30 }
  0xa3   :  { %118 = vst.msk [vmem:[%s244_s1 + $0x70] sm:$0xff] %vm102_vm0, %v83_v31 }
  0xa4   :  { %124 = vsyncpa [#allocation3], 1 }

</bundles_post_ra>
